<compile_context>
chip_gen: v7x
topology: tpu7x:2x2x1
jax: 0.10.0
libtpu: 0.0.40
codegen_flags: <defaults>
</compile_context>

<pallas_src>
import functools

import jax
import jax.numpy as jnp
from jax.experimental import pallas as pl

BN_EPS = 1e-5


def _pad128(d):
    return ((d + 127) // 128) * 128


# ----------------------------- kernel ---------------------------------------

def _mm(a_f32, w_ref):
    """bf16 MXU matmul with f32 accumulation."""
    return jnp.dot(a_f32.astype(jnp.bfloat16), w_ref[...],
                   preferred_element_type=jnp.float32)


def _bn(h, gamma, beta, *, num_views, batch, relu):
    """Training-mode BatchNorm1d with per-view batch statistics.

    h: (num_views*batch, D) f32; views are contiguous blocks of `batch` rows.
    Stats computed per view with static (sublane-aligned) slices.  gamma is
    folded into the inverse std (saves one full-width VPU multiply per layer).
    """
    outs = []
    for v in range(num_views):
        hv = h[v * batch:(v + 1) * batch, :]
        mu = jnp.mean(hv, axis=0, keepdims=True)
        xc = hv - mu
        var = jnp.mean(xc * xc, axis=0, keepdims=True)
        scale = gamma * jax.lax.rsqrt(var + BN_EPS)            # (1, D)
        outs.append(xc * scale + beta)
    y = outs[0] if num_views == 1 else jnp.concatenate(outs, axis=0)
    return jnp.maximum(y, 0.0) if relu else y


def simsiam_kernel(
    x_ref,                                 # (V*B, C*H*W), views stacked on rows
    bw_ref, bb_ref,                        # backbone Linear (avg-pool folded in)
    w1_ref, g1_ref, be1_ref,               # projection l1: Linear(+BN+ReLU)
    w2_ref, g2_ref, be2_ref,               # projection l2: Linear(+BN+ReLU)
    w3_ref, g3_ref, be3_ref,               # projection l3: Linear(+BN)
    wp1_ref, gp_ref, bep_ref,              # prediction l1: Linear(+BN+ReLU)
    wp2_ref, bp2_ref,                      # prediction l2: Linear
    out_ref,                               # (V*B, 2*OP + FP)  [z | p | f]
    *, num_views, batch,
):
    bn = functools.partial(_bn, num_views=num_views, batch=batch)

    # Backbone: global-avg-pool folded into bw, so it is a single K=C*HW dot.
    x = x_ref[...].astype(jnp.float32)
    f = _mm(x, bw_ref) + bb_ref[...]                           # (VB, FP)

    # Projection MLP (pre-BN biases dropped: exact under training-mode BN).
    h = bn(_mm(f, w1_ref), g1_ref[...], be1_ref[...], relu=True)
    h = bn(_mm(h, w2_ref), g2_ref[...], be2_ref[...], relu=True)
    z = bn(_mm(h, w3_ref), g3_ref[...], be3_ref[...], relu=False)

    # Prediction MLP.
    q = bn(_mm(z, wp1_ref), gp_ref[...], bep_ref[...], relu=True)
    p = _mm(q, wp2_ref) + bp2_ref[...]

    # Lane-dense stores: OP and FP are multiples of 128, so every slice
    # boundary is 128-aligned -> unmasked full-lane vector stores.
    op = w3_ref.shape[1]
    out_ref[:, :op] = z
    out_ref[:, op:2 * op] = p
    out_ref[:, 2 * op:] = f


# ----------------------------- wrapper ---------------------------------------

def simsiam_forward(params, x0, x1=None, *, dims, return_features=False):
    """Mirrors SimSiam.forward: (z, p) per view, optionally features f."""
    xs = (x0,) if x1 is None else (x0, x1)
    V = len(xs)
    B, C, H, W = x0.shape
    CHW = C * H * W
    VB = V * B

    # Flatten channel+spatial and fold views onto the batch axis; keep native
    # dtype (cast in-kernel).
    x = jnp.concatenate([xv.reshape(B, CHW) for xv in xs], axis=0)   # (VB, CHW)

    FP = params["bw"].shape[1]
    HP = params["w1"].shape[1]
    PP = params["wp1"].shape[1]
    OP = params["w3"].shape[1]
    num_ftrs, out_dim = dims["num_ftrs"], dims["out_dim"]
    total = 2 * OP + FP

    weight_args = (
        params["bw"], params["bb"],
        params["w1"], params["g1"], params["be1"],
        params["w2"], params["g2"], params["be2"],
        params["w3"], params["g3"], params["be3"],
        params["wp1"], params["gp"], params["bep"],
        params["wp2"], params["bp2"],
    )

    nbytes = lambda a: a.size * a.dtype.itemsize
    cost = pl.CostEstimate(
        flops=2 * VB * (CHW * FP + FP * HP + HP * HP + HP * OP
                        + OP * PP + PP * OP),
        transcendentals=V * (2 * HP + OP + PP),        # rsqrt per BN feature/view
        bytes_accessed=nbytes(x) + sum(nbytes(a) for a in weight_args)
        + VB * total * 4,
    )

    # Single kernel invocation (no grid): every operand is whole-array
    # VMEM-resident (default full-array BlockSpecs); views were folded into the
    # batch axis above, so there is no per-step pipeline overhead.
    out = pl.pallas_call(
        functools.partial(simsiam_kernel, num_views=V, batch=B),
        out_shape=jax.ShapeDtypeStruct((VB, total), jnp.float32),
        cost_estimate=cost,
    )(x, *weight_args)

    z_all = out[:, :out_dim]
    p_all = out[:, OP:OP + out_dim]
    f_all = out[:, 2 * OP:2 * OP + num_ftrs]

    def pack(v):
        sl = slice(v * B, (v + 1) * B)
        res = (z_all[sl], p_all[sl])
        return (res, f_all[sl]) if return_features else res

    out0 = pack(0)
    if x1 is None:
        return out0
    return out0, pack(1)


# ----------------------------- parameter init --------------------------------

def _uniform(key, shape, bound):
    return jax.random.uniform(key, shape, jnp.float32, -bound, bound)


def init_params(key, in_channels, hw, num_ftrs, proj_hidden_dim,
                pred_hidden_dim, out_dim):
    """torch-default-style init; feature dims zero-padded to multiples of 128
    (exact under per-feature training-mode BN); weights stored bf16."""
    FP, HP = _pad128(num_ftrs), _pad128(proj_hidden_dim)
    PP, OP = _pad128(pred_hidden_dim), _pad128(out_dim)

    def linear_w(k, fan_in, fan_out, rows_p, cols_p):
        w = _uniform(k, (fan_in, fan_out), 1.0 / (fan_in ** 0.5))
        w = jnp.pad(w, ((0, rows_p - fan_in), (0, cols_p - fan_out)))
        return w.astype(jnp.bfloat16)

    def vec(val, cols, cols_p):
        return jnp.pad(jnp.full((1, cols), val, jnp.float32),
                       ((0, 0), (0, cols_p - cols)))

    keys = jax.random.split(key, 8)

    # Synthetic backbone: global-avg-pool + Linear(C -> num_ftrs).  Pool folded
    # into the weight: bw_exp[c*HW + s, j] = bw[c, j] / HW.
    bound_b = 1.0 / (in_channels ** 0.5)
    bw = _uniform(keys[0], (in_channels, num_ftrs), bound_b)
    bw_exp = jnp.repeat(bw, hw, axis=0) / hw                     # (C*HW, num_ftrs)
    bw_exp = jnp.pad(bw_exp, ((0, 0), (0, FP - num_ftrs))).astype(jnp.bfloat16)
    bb = jnp.pad(_uniform(keys[1], (1, num_ftrs), bound_b),
                 ((0, 0), (0, FP - num_ftrs)))

    params = dict(
        bw=bw_exp, bb=bb,
        # projection MLP (pre-BN biases dropped: dead under training-mode BN)
        w1=linear_w(keys[2], num_ftrs, proj_hidden_dim, FP, HP),
        g1=vec(1.0, proj_hidden_dim, HP), be1=vec(0.0, proj_hidden_dim, HP),
        w2=linear_w(keys[3], proj_hidden_dim, proj_hidden_dim, HP, HP),
        g2=vec(1.0, proj_hidden_dim, HP), be2=vec(0.0, proj_hidden_dim, HP),
        w3=linear_w(keys[4], proj_hidden_dim, out_dim, HP, OP),
        g3=vec(1.0, out_dim, OP), be3=vec(0.0, out_dim, OP),
        # prediction MLP
        wp1=linear_w(keys[5], out_dim, pred_hidden_dim, OP, PP),
        gp=vec(1.0, pred_hidden_dim, PP), bep=vec(0.0, pred_hidden_dim, PP),
        wp2=linear_w(keys[6], pred_hidden_dim, out_dim, PP, OP),
        bp2=jnp.pad(_uniform(keys[7], (1, out_dim),
                             1.0 / (pred_hidden_dim ** 0.5)),
                    ((0, 0), (0, OP - out_dim))),
    )
    dims = dict(num_ftrs=num_ftrs, out_dim=out_dim)
    return params, dims


# ----------------------------- main -------------------------------------------

if __name__ == "__main__":
    # SimSiam-consistent small shapes: num_ftrs=32, proj_hidden=32,
    # pred_hidden=num_ftrs/4=8, out_dim=32.  Batch=8 fills the sublane axis;
    # both views fold to one 16-row slab.
    B, C, H, W = 8, 4, 16, 16
    NUM_FTRS, PROJ_H, PRED_H, OUT = 32, 32, 8, 32

    key = jax.random.PRNGKey(0)
    kp, k0, k1 = jax.random.split(key, 3)
    params, dims = init_params(kp, C, H * W, NUM_FTRS, PROJ_H, PRED_H, OUT)

    x0 = jax.random.normal(k0, (B, C, H, W), jnp.float32)
    x1 = jax.random.normal(k1, (B, C, H, W), jnp.float32)

    # Two views, with features.
    fwd = jax.jit(functools.partial(simsiam_forward, dims=dims,
                                    return_features=True))
    ((z0, p0), f0), ((z1, p1), f1) = fwd(params, x0, x1)
    jax.block_until_ready((z0, p0, f0, z1, p1, f1))

    assert z0.shape == (B, OUT) and p0.shape == (B, OUT) and f0.shape == (B, NUM_FTRS)
    assert z1.shape == (B, OUT) and p1.shape == (B, OUT) and f1.shape == (B, NUM_FTRS)
    assert all(bool(jnp.all(jnp.isfinite(a))) for a in (z0, p0, f0, z1, p1, f1))

    # Single-view path (x1=None), no features.
    zs, ps = jax.jit(functools.partial(simsiam_forward, dims=dims))(params, x0)
    jax.block_until_ready((zs, ps))
    assert zs.shape == (B, OUT) and ps.shape == (B, OUT)

    print("KERNEL_OK")
</pallas_src>

<mosaic_0001>
module attributes {stable_mosaic.version = 11 : i64} {
  func.func @simsiam_kernel(%arg0: memref<16x1024xf32, #tpu.memory_space<vmem>>, %arg1: memref<1024x128xbf16, #tpu.memory_space<vmem>>, %arg2: memref<1x128xf32, #tpu.memory_space<vmem>>, %arg3: memref<128x128xbf16, #tpu.memory_space<vmem>>, %arg4: memref<1x128xf32, #tpu.memory_space<vmem>>, %arg5: memref<1x128xf32, #tpu.memory_space<vmem>>, %arg6: memref<128x128xbf16, #tpu.memory_space<vmem>>, %arg7: memref<1x128xf32, #tpu.memory_space<vmem>>, %arg8: memref<1x128xf32, #tpu.memory_space<vmem>>, %arg9: memref<128x128xbf16, #tpu.memory_space<vmem>>, %arg10: memref<1x128xf32, #tpu.memory_space<vmem>>, %arg11: memref<1x128xf32, #tpu.memory_space<vmem>>, %arg12: memref<128x128xbf16, #tpu.memory_space<vmem>>, %arg13: memref<1x128xf32, #tpu.memory_space<vmem>>, %arg14: memref<1x128xf32, #tpu.memory_space<vmem>>, %arg15: memref<128x128xbf16, #tpu.memory_space<vmem>>, %arg16: memref<1x128xf32, #tpu.memory_space<vmem>>, %arg17: memref<16x384xf32, #tpu.memory_space<vmem>>) attributes {dimension_semantics = [], scalar_prefetch = 0 : i64, scratch_operands = 0 : i64, tpu.core_type = #tpu.core_type<tc>} {
    %c0 = arith.constant 0 : index
    %c0_0 = arith.constant 0 : index
    %0 = vector.load %arg0[%c0, %c0_0] : memref<16x1024xf32, #tpu.memory_space<vmem>>, vector<16x1024xf32>
    %1 = arith.truncf %0 : vector<16x1024xf32> to vector<16x1024xbf16>
    %c0_1 = arith.constant 0 : index
    %c0_2 = arith.constant 0 : index
    %2 = vector.load %arg1[%c0_1, %c0_2] : memref<1024x128xbf16, #tpu.memory_space<vmem>>, vector<1024x128xbf16>
    %cst = arith.constant dense<0.000000e+00> : vector<16x128xf32>
    %3 = tpu.matmul %1, %2, %cst {dimension_numbers = #tpu.dot_dimension_numbers<[1], [0], [0], [1], [0, 0, 1, 1], [], []>} : vector<16x1024xbf16>, vector<1024x128xbf16>, vector<16x128xf32> -> vector<16x128xf32>
    %c0_3 = arith.constant 0 : index
    %c0_4 = arith.constant 0 : index
    %4 = vector.load %arg2[%c0_3, %c0_4] : memref<1x128xf32, #tpu.memory_space<vmem>>, vector<1x128xf32>
    %5 = vector.broadcast %4 : vector<1x128xf32> to vector<16x128xf32>
    %6 = arith.addf %3, %5 : vector<16x128xf32>
    %7 = arith.truncf %6 : vector<16x128xf32> to vector<16x128xbf16>
    %c0_5 = arith.constant 0 : index
    %c0_6 = arith.constant 0 : index
    %8 = vector.load %arg3[%c0_5, %c0_6] : memref<128x128xbf16, #tpu.memory_space<vmem>>, vector<128x128xbf16>
    %cst_7 = arith.constant dense<0.000000e+00> : vector<16x128xf32>
    %9 = tpu.matmul %7, %8, %cst_7 {dimension_numbers = #tpu.dot_dimension_numbers<[1], [0], [0], [1], [0, 0, 1, 1], [], []>} : vector<16x128xbf16>, vector<128x128xbf16>, vector<16x128xf32> -> vector<16x128xf32>
    %c0_8 = arith.constant 0 : index
    %c0_9 = arith.constant 0 : index
    %10 = vector.load %arg4[%c0_8, %c0_9] : memref<1x128xf32, #tpu.memory_space<vmem>>, vector<1x128xf32>
    %c0_10 = arith.constant 0 : index
    %c0_11 = arith.constant 0 : index
    %11 = vector.load %arg5[%c0_10, %c0_11] : memref<1x128xf32, #tpu.memory_space<vmem>>, vector<1x128xf32>
    %12 = vector.extract_strided_slice %9 {offsets = [0, 0], sizes = [8, 128], strides = [1, 1]} : vector<16x128xf32> to vector<8x128xf32>
    %cst_12 = arith.constant dense<0.000000e+00> : vector<128xf32>
    %13 = vector.multi_reduction <add>, %12, %cst_12 [0] : vector<8x128xf32> to vector<128xf32>
    %14 = vector.shape_cast %13 : vector<128xf32> to vector<1x128xf32>
    %cst_13 = arith.constant 8.000000e+00 : f32
    %15 = vector.broadcast %cst_13 : f32 to vector<1x128xf32>
    %16 = arith.divf %14, %15 : vector<1x128xf32>
    %17 = vector.broadcast %16 : vector<1x128xf32> to vector<8x128xf32>
    %18 = arith.subf %12, %17 : vector<8x128xf32>
    %19 = arith.mulf %18, %18 : vector<8x128xf32>
    %cst_14 = arith.constant dense<0.000000e+00> : vector<128xf32>
    %20 = vector.multi_reduction <add>, %19, %cst_14 [0] : vector<8x128xf32> to vector<128xf32>
    %21 = vector.shape_cast %20 : vector<128xf32> to vector<1x128xf32>
    %cst_15 = arith.constant 8.000000e+00 : f32
    %22 = vector.broadcast %cst_15 : f32 to vector<1x128xf32>
    %23 = arith.divf %21, %22 : vector<1x128xf32>
    %cst_16 = arith.constant 9.99999974E-6 : f32
    %24 = vector.broadcast %cst_16 : f32 to vector<1x128xf32>
    %25 = arith.addf %23, %24 : vector<1x128xf32>
    %26 = math.rsqrt %25 : vector<1x128xf32>
    %27 = arith.mulf %10, %26 : vector<1x128xf32>
    %28 = vector.broadcast %27 : vector<1x128xf32> to vector<8x128xf32>
    %29 = arith.mulf %18, %28 : vector<8x128xf32>
    %30 = vector.broadcast %11 : vector<1x128xf32> to vector<8x128xf32>
    %31 = arith.addf %29, %30 : vector<8x128xf32>
    %32 = vector.extract_strided_slice %9 {offsets = [8, 0], sizes = [8, 128], strides = [1, 1]} : vector<16x128xf32> to vector<8x128xf32>
    %cst_17 = arith.constant dense<0.000000e+00> : vector<128xf32>
    %33 = vector.multi_reduction <add>, %32, %cst_17 [0] : vector<8x128xf32> to vector<128xf32>
    %34 = vector.shape_cast %33 : vector<128xf32> to vector<1x128xf32>
    %cst_18 = arith.constant 8.000000e+00 : f32
    %35 = vector.broadcast %cst_18 : f32 to vector<1x128xf32>
    %36 = arith.divf %34, %35 : vector<1x128xf32>
    %37 = vector.broadcast %36 : vector<1x128xf32> to vector<8x128xf32>
    %38 = arith.subf %32, %37 : vector<8x128xf32>
    %39 = arith.mulf %38, %38 : vector<8x128xf32>
    %cst_19 = arith.constant dense<0.000000e+00> : vector<128xf32>
    %40 = vector.multi_reduction <add>, %39, %cst_19 [0] : vector<8x128xf32> to vector<128xf32>
    %41 = vector.shape_cast %40 : vector<128xf32> to vector<1x128xf32>
    %cst_20 = arith.constant 8.000000e+00 : f32
    %42 = vector.broadcast %cst_20 : f32 to vector<1x128xf32>
    %43 = arith.divf %41, %42 : vector<1x128xf32>
    %cst_21 = arith.constant 9.99999974E-6 : f32
    %44 = vector.broadcast %cst_21 : f32 to vector<1x128xf32>
    %45 = arith.addf %43, %44 : vector<1x128xf32>
    %46 = math.rsqrt %45 : vector<1x128xf32>
    %47 = arith.mulf %10, %46 : vector<1x128xf32>
    %48 = vector.broadcast %47 : vector<1x128xf32> to vector<8x128xf32>
    %49 = arith.mulf %38, %48 : vector<8x128xf32>
    %50 = vector.broadcast %11 : vector<1x128xf32> to vector<8x128xf32>
    %51 = arith.addf %49, %50 : vector<8x128xf32>
    %52 = tpu.concatenate %31, %51 in 0 : vector<8x128xf32>, vector<8x128xf32> -> vector<16x128xf32>
    %cst_22 = arith.constant 0.000000e+00 : f32
    %53 = vector.broadcast %cst_22 : f32 to vector<16x128xf32>
    %54 = arith.maximumf %52, %53 : vector<16x128xf32>
    %55 = arith.truncf %54 : vector<16x128xf32> to vector<16x128xbf16>
    %c0_23 = arith.constant 0 : index
    %c0_24 = arith.constant 0 : index
    %56 = vector.load %arg6[%c0_23, %c0_24] : memref<128x128xbf16, #tpu.memory_space<vmem>>, vector<128x128xbf16>
    %cst_25 = arith.constant dense<0.000000e+00> : vector<16x128xf32>
    %57 = tpu.matmul %55, %56, %cst_25 {dimension_numbers = #tpu.dot_dimension_numbers<[1], [0], [0], [1], [0, 0, 1, 1], [], []>} : vector<16x128xbf16>, vector<128x128xbf16>, vector<16x128xf32> -> vector<16x128xf32>
    %c0_26 = arith.constant 0 : index
    %c0_27 = arith.constant 0 : index
    %58 = vector.load %arg7[%c0_26, %c0_27] : memref<1x128xf32, #tpu.memory_space<vmem>>, vector<1x128xf32>
    %c0_28 = arith.constant 0 : index
    %c0_29 = arith.constant 0 : index
    %59 = vector.load %arg8[%c0_28, %c0_29] : memref<1x128xf32, #tpu.memory_space<vmem>>, vector<1x128xf32>
    %60 = vector.extract_strided_slice %57 {offsets = [0, 0], sizes = [8, 128], strides = [1, 1]} : vector<16x128xf32> to vector<8x128xf32>
    %cst_30 = arith.constant dense<0.000000e+00> : vector<128xf32>
    %61 = vector.multi_reduction <add>, %60, %cst_30 [0] : vector<8x128xf32> to vector<128xf32>
    %62 = vector.shape_cast %61 : vector<128xf32> to vector<1x128xf32>
    %cst_31 = arith.constant 8.000000e+00 : f32
    %63 = vector.broadcast %cst_31 : f32 to vector<1x128xf32>
    %64 = arith.divf %62, %63 : vector<1x128xf32>
    %65 = vector.broadcast %64 : vector<1x128xf32> to vector<8x128xf32>
    %66 = arith.subf %60, %65 : vector<8x128xf32>
    %67 = arith.mulf %66, %66 : vector<8x128xf32>
    %cst_32 = arith.constant dense<0.000000e+00> : vector<128xf32>
    %68 = vector.multi_reduction <add>, %67, %cst_32 [0] : vector<8x128xf32> to vector<128xf32>
    %69 = vector.shape_cast %68 : vector<128xf32> to vector<1x128xf32>
    %cst_33 = arith.constant 8.000000e+00 : f32
    %70 = vector.broadcast %cst_33 : f32 to vector<1x128xf32>
    %71 = arith.divf %69, %70 : vector<1x128xf32>
    %cst_34 = arith.constant 9.99999974E-6 : f32
    %72 = vector.broadcast %cst_34 : f32 to vector<1x128xf32>
    %73 = arith.addf %71, %72 : vector<1x128xf32>
    %74 = math.rsqrt %73 : vector<1x128xf32>
    %75 = arith.mulf %58, %74 : vector<1x128xf32>
    %76 = vector.broadcast %75 : vector<1x128xf32> to vector<8x128xf32>
    %77 = arith.mulf %66, %76 : vector<8x128xf32>
    %78 = vector.broadcast %59 : vector<1x128xf32> to vector<8x128xf32>
    %79 = arith.addf %77, %78 : vector<8x128xf32>
    %80 = vector.extract_strided_slice %57 {offsets = [8, 0], sizes = [8, 128], strides = [1, 1]} : vector<16x128xf32> to vector<8x128xf32>
    %cst_35 = arith.constant dense<0.000000e+00> : vector<128xf32>
    %81 = vector.multi_reduction <add>, %80, %cst_35 [0] : vector<8x128xf32> to vector<128xf32>
    %82 = vector.shape_cast %81 : vector<128xf32> to vector<1x128xf32>
    %cst_36 = arith.constant 8.000000e+00 : f32
    %83 = vector.broadcast %cst_36 : f32 to vector<1x128xf32>
    %84 = arith.divf %82, %83 : vector<1x128xf32>
    %85 = vector.broadcast %84 : vector<1x128xf32> to vector<8x128xf32>
    %86 = arith.subf %80, %85 : vector<8x128xf32>
    %87 = arith.mulf %86, %86 : vector<8x128xf32>
    %cst_37 = arith.constant dense<0.000000e+00> : vector<128xf32>
    %88 = vector.multi_reduction <add>, %87, %cst_37 [0] : vector<8x128xf32> to vector<128xf32>
    %89 = vector.shape_cast %88 : vector<128xf32> to vector<1x128xf32>
    %cst_38 = arith.constant 8.000000e+00 : f32
    %90 = vector.broadcast %cst_38 : f32 to vector<1x128xf32>
    %91 = arith.divf %89, %90 : vector<1x128xf32>
    %cst_39 = arith.constant 9.99999974E-6 : f32
    %92 = vector.broadcast %cst_39 : f32 to vector<1x128xf32>
    %93 = arith.addf %91, %92 : vector<1x128xf32>
    %94 = math.rsqrt %93 : vector<1x128xf32>
    %95 = arith.mulf %58, %94 : vector<1x128xf32>
    %96 = vector.broadcast %95 : vector<1x128xf32> to vector<8x128xf32>
    %97 = arith.mulf %86, %96 : vector<8x128xf32>
    %98 = vector.broadcast %59 : vector<1x128xf32> to vector<8x128xf32>
    %99 = arith.addf %97, %98 : vector<8x128xf32>
    %100 = tpu.concatenate %79, %99 in 0 : vector<8x128xf32>, vector<8x128xf32> -> vector<16x128xf32>
    %cst_40 = arith.constant 0.000000e+00 : f32
    %101 = vector.broadcast %cst_40 : f32 to vector<16x128xf32>
    %102 = arith.maximumf %100, %101 : vector<16x128xf32>
    %103 = arith.truncf %102 : vector<16x128xf32> to vector<16x128xbf16>
    %c0_41 = arith.constant 0 : index
    %c0_42 = arith.constant 0 : index
    %104 = vector.load %arg9[%c0_41, %c0_42] : memref<128x128xbf16, #tpu.memory_space<vmem>>, vector<128x128xbf16>
    %cst_43 = arith.constant dense<0.000000e+00> : vector<16x128xf32>
    %105 = tpu.matmul %103, %104, %cst_43 {dimension_numbers = #tpu.dot_dimension_numbers<[1], [0], [0], [1], [0, 0, 1, 1], [], []>} : vector<16x128xbf16>, vector<128x128xbf16>, vector<16x128xf32> -> vector<16x128xf32>
    %c0_44 = arith.constant 0 : index
    %c0_45 = arith.constant 0 : index
    %106 = vector.load %arg10[%c0_44, %c0_45] : memref<1x128xf32, #tpu.memory_space<vmem>>, vector<1x128xf32>
    %c0_46 = arith.constant 0 : index
    %c0_47 = arith.constant 0 : index
    %107 = vector.load %arg11[%c0_46, %c0_47] : memref<1x128xf32, #tpu.memory_space<vmem>>, vector<1x128xf32>
    %108 = vector.extract_strided_slice %105 {offsets = [0, 0], sizes = [8, 128], strides = [1, 1]} : vector<16x128xf32> to vector<8x128xf32>
    %cst_48 = arith.constant dense<0.000000e+00> : vector<128xf32>
    %109 = vector.multi_reduction <add>, %108, %cst_48 [0] : vector<8x128xf32> to vector<128xf32>
    %110 = vector.shape_cast %109 : vector<128xf32> to vector<1x128xf32>
    %cst_49 = arith.constant 8.000000e+00 : f32
    %111 = vector.broadcast %cst_49 : f32 to vector<1x128xf32>
    %112 = arith.divf %110, %111 : vector<1x128xf32>
    %113 = vector.broadcast %112 : vector<1x128xf32> to vector<8x128xf32>
    %114 = arith.subf %108, %113 : vector<8x128xf32>
    %115 = arith.mulf %114, %114 : vector<8x128xf32>
    %cst_50 = arith.constant dense<0.000000e+00> : vector<128xf32>
    %116 = vector.multi_reduction <add>, %115, %cst_50 [0] : vector<8x128xf32> to vector<128xf32>
    %117 = vector.shape_cast %116 : vector<128xf32> to vector<1x128xf32>
    %cst_51 = arith.constant 8.000000e+00 : f32
    %118 = vector.broadcast %cst_51 : f32 to vector<1x128xf32>
    %119 = arith.divf %117, %118 : vector<1x128xf32>
    %cst_52 = arith.constant 9.99999974E-6 : f32
    %120 = vector.broadcast %cst_52 : f32 to vector<1x128xf32>
    %121 = arith.addf %119, %120 : vector<1x128xf32>
    %122 = math.rsqrt %121 : vector<1x128xf32>
    %123 = arith.mulf %106, %122 : vector<1x128xf32>
    %124 = vector.broadcast %123 : vector<1x128xf32> to vector<8x128xf32>
    %125 = arith.mulf %114, %124 : vector<8x128xf32>
    %126 = vector.broadcast %107 : vector<1x128xf32> to vector<8x128xf32>
    %127 = arith.addf %125, %126 : vector<8x128xf32>
    %128 = vector.extract_strided_slice %105 {offsets = [8, 0], sizes = [8, 128], strides = [1, 1]} : vector<16x128xf32> to vector<8x128xf32>
    %cst_53 = arith.constant dense<0.000000e+00> : vector<128xf32>
    %129 = vector.multi_reduction <add>, %128, %cst_53 [0] : vector<8x128xf32> to vector<128xf32>
    %130 = vector.shape_cast %129 : vector<128xf32> to vector<1x128xf32>
    %cst_54 = arith.constant 8.000000e+00 : f32
    %131 = vector.broadcast %cst_54 : f32 to vector<1x128xf32>
    %132 = arith.divf %130, %131 : vector<1x128xf32>
    %133 = vector.broadcast %132 : vector<1x128xf32> to vector<8x128xf32>
    %134 = arith.subf %128, %133 : vector<8x128xf32>
    %135 = arith.mulf %134, %134 : vector<8x128xf32>
    %cst_55 = arith.constant dense<0.000000e+00> : vector<128xf32>
    %136 = vector.multi_reduction <add>, %135, %cst_55 [0] : vector<8x128xf32> to vector<128xf32>
    %137 = vector.shape_cast %136 : vector<128xf32> to vector<1x128xf32>
    %cst_56 = arith.constant 8.000000e+00 : f32
    %138 = vector.broadcast %cst_56 : f32 to vector<1x128xf32>
    %139 = arith.divf %137, %138 : vector<1x128xf32>
    %cst_57 = arith.constant 9.99999974E-6 : f32
    %140 = vector.broadcast %cst_57 : f32 to vector<1x128xf32>
    %141 = arith.addf %139, %140 : vector<1x128xf32>
    %142 = math.rsqrt %141 : vector<1x128xf32>
    %143 = arith.mulf %106, %142 : vector<1x128xf32>
    %144 = vector.broadcast %143 : vector<1x128xf32> to vector<8x128xf32>
    %145 = arith.mulf %134, %144 : vector<8x128xf32>
    %146 = vector.broadcast %107 : vector<1x128xf32> to vector<8x128xf32>
    %147 = arith.addf %145, %146 : vector<8x128xf32>
    %148 = tpu.concatenate %127, %147 in 0 : vector<8x128xf32>, vector<8x128xf32> -> vector<16x128xf32>
    %149 = arith.truncf %148 : vector<16x128xf32> to vector<16x128xbf16>
    %c0_58 = arith.constant 0 : index
    %c0_59 = arith.constant 0 : index
    %150 = vector.load %arg12[%c0_58, %c0_59] : memref<128x128xbf16, #tpu.memory_space<vmem>>, vector<128x128xbf16>
    %cst_60 = arith.constant dense<0.000000e+00> : vector<16x128xf32>
    %151 = tpu.matmul %149, %150, %cst_60 {dimension_numbers = #tpu.dot_dimension_numbers<[1], [0], [0], [1], [0, 0, 1, 1], [], []>} : vector<16x128xbf16>, vector<128x128xbf16>, vector<16x128xf32> -> vector<16x128xf32>
    %c0_61 = arith.constant 0 : index
    %c0_62 = arith.constant 0 : index
    %152 = vector.load %arg13[%c0_61, %c0_62] : memref<1x128xf32, #tpu.memory_space<vmem>>, vector<1x128xf32>
    %c0_63 = arith.constant 0 : index
    %c0_64 = arith.constant 0 : index
    %153 = vector.load %arg14[%c0_63, %c0_64] : memref<1x128xf32, #tpu.memory_space<vmem>>, vector<1x128xf32>
    %154 = vector.extract_strided_slice %151 {offsets = [0, 0], sizes = [8, 128], strides = [1, 1]} : vector<16x128xf32> to vector<8x128xf32>
    %cst_65 = arith.constant dense<0.000000e+00> : vector<128xf32>
    %155 = vector.multi_reduction <add>, %154, %cst_65 [0] : vector<8x128xf32> to vector<128xf32>
    %156 = vector.shape_cast %155 : vector<128xf32> to vector<1x128xf32>
    %cst_66 = arith.constant 8.000000e+00 : f32
    %157 = vector.broadcast %cst_66 : f32 to vector<1x128xf32>
    %158 = arith.divf %156, %157 : vector<1x128xf32>
    %159 = vector.broadcast %158 : vector<1x128xf32> to vector<8x128xf32>
    %160 = arith.subf %154, %159 : vector<8x128xf32>
    %161 = arith.mulf %160, %160 : vector<8x128xf32>
    %cst_67 = arith.constant dense<0.000000e+00> : vector<128xf32>
    %162 = vector.multi_reduction <add>, %161, %cst_67 [0] : vector<8x128xf32> to vector<128xf32>
    %163 = vector.shape_cast %162 : vector<128xf32> to vector<1x128xf32>
    %cst_68 = arith.constant 8.000000e+00 : f32
    %164 = vector.broadcast %cst_68 : f32 to vector<1x128xf32>
    %165 = arith.divf %163, %164 : vector<1x128xf32>
    %cst_69 = arith.constant 9.99999974E-6 : f32
    %166 = vector.broadcast %cst_69 : f32 to vector<1x128xf32>
    %167 = arith.addf %165, %166 : vector<1x128xf32>
    %168 = math.rsqrt %167 : vector<1x128xf32>
    %169 = arith.mulf %152, %168 : vector<1x128xf32>
    %170 = vector.broadcast %169 : vector<1x128xf32> to vector<8x128xf32>
    %171 = arith.mulf %160, %170 : vector<8x128xf32>
    %172 = vector.broadcast %153 : vector<1x128xf32> to vector<8x128xf32>
    %173 = arith.addf %171, %172 : vector<8x128xf32>
    %174 = vector.extract_strided_slice %151 {offsets = [8, 0], sizes = [8, 128], strides = [1, 1]} : vector<16x128xf32> to vector<8x128xf32>
    %cst_70 = arith.constant dense<0.000000e+00> : vector<128xf32>
    %175 = vector.multi_reduction <add>, %174, %cst_70 [0] : vector<8x128xf32> to vector<128xf32>
    %176 = vector.shape_cast %175 : vector<128xf32> to vector<1x128xf32>
    %cst_71 = arith.constant 8.000000e+00 : f32
    %177 = vector.broadcast %cst_71 : f32 to vector<1x128xf32>
    %178 = arith.divf %176, %177 : vector<1x128xf32>
    %179 = vector.broadcast %178 : vector<1x128xf32> to vector<8x128xf32>
    %180 = arith.subf %174, %179 : vector<8x128xf32>
    %181 = arith.mulf %180, %180 : vector<8x128xf32>
    %cst_72 = arith.constant dense<0.000000e+00> : vector<128xf32>
    %182 = vector.multi_reduction <add>, %181, %cst_72 [0] : vector<8x128xf32> to vector<128xf32>
    %183 = vector.shape_cast %182 : vector<128xf32> to vector<1x128xf32>
    %cst_73 = arith.constant 8.000000e+00 : f32
    %184 = vector.broadcast %cst_73 : f32 to vector<1x128xf32>
    %185 = arith.divf %183, %184 : vector<1x128xf32>
    %cst_74 = arith.constant 9.99999974E-6 : f32
    %186 = vector.broadcast %cst_74 : f32 to vector<1x128xf32>
    %187 = arith.addf %185, %186 : vector<1x128xf32>
    %188 = math.rsqrt %187 : vector<1x128xf32>
    %189 = arith.mulf %152, %188 : vector<1x128xf32>
    %190 = vector.broadcast %189 : vector<1x128xf32> to vector<8x128xf32>
    %191 = arith.mulf %180, %190 : vector<8x128xf32>
    %192 = vector.broadcast %153 : vector<1x128xf32> to vector<8x128xf32>
    %193 = arith.addf %191, %192 : vector<8x128xf32>
    %194 = tpu.concatenate %173, %193 in 0 : vector<8x128xf32>, vector<8x128xf32> -> vector<16x128xf32>
    %cst_75 = arith.constant 0.000000e+00 : f32
    %195 = vector.broadcast %cst_75 : f32 to vector<16x128xf32>
    %196 = arith.maximumf %194, %195 : vector<16x128xf32>
    %197 = arith.truncf %196 : vector<16x128xf32> to vector<16x128xbf16>
    %c0_76 = arith.constant 0 : index
    %c0_77 = arith.constant 0 : index
    %198 = vector.load %arg15[%c0_76, %c0_77] : memref<128x128xbf16, #tpu.memory_space<vmem>>, vector<128x128xbf16>
    %cst_78 = arith.constant dense<0.000000e+00> : vector<16x128xf32>
    %199 = tpu.matmul %197, %198, %cst_78 {dimension_numbers = #tpu.dot_dimension_numbers<[1], [0], [0], [1], [0, 0, 1, 1], [], []>} : vector<16x128xbf16>, vector<128x128xbf16>, vector<16x128xf32> -> vector<16x128xf32>
    %c0_79 = arith.constant 0 : index
    %c0_80 = arith.constant 0 : index
    %200 = vector.load %arg16[%c0_79, %c0_80] : memref<1x128xf32, #tpu.memory_space<vmem>>, vector<1x128xf32>
    %201 = vector.broadcast %200 : vector<1x128xf32> to vector<16x128xf32>
    %202 = arith.addf %199, %201 : vector<16x128xf32>
    %c0_81 = arith.constant 0 : index
    %c0_82 = arith.constant 0 : index
    %203 = vector.load %arg17[%c0_81, %c0_82] : memref<16x384xf32, #tpu.memory_space<vmem>>, vector<16x128xf32>
    tpu.vector_store %arg17[%c0_81, %c0_82], %148 {strides = array<i32>} : memref<16x384xf32, #tpu.memory_space<vmem>>, vector<16x128xf32>,
    %c0_83 = arith.constant 0 : index
    %c128 = arith.constant 128 : index
    %204 = vector.load %arg17[%c0_83, %c128] : memref<16x384xf32, #tpu.memory_space<vmem>>, vector<16x128xf32>
    tpu.vector_store %arg17[%c0_83, %c128], %202 {strides = array<i32>} : memref<16x384xf32, #tpu.memory_space<vmem>>, vector<16x128xf32>,
    %c0_84 = arith.constant 0 : index
    %c256 = arith.constant 256 : index
    %205 = vector.load %arg17[%c0_84, %c256] : memref<16x384xf32, #tpu.memory_space<vmem>>, vector<16x128xf32>
    tpu.vector_store %arg17[%c0_84, %c256], %6 {strides = array<i32>} : memref<16x384xf32, #tpu.memory_space<vmem>>, vector<16x128xf32>,
    return
  }
}

</mosaic_0001>

<bundles_post_ra>
// kernel: simsiam_forward.1
= control target key start
LH: loop header
LB: loop body
LE: loop exit
PB: predicated region body
PF: predicated region fallthrough
CT: control target
= control target key end

     0   :  { %vm2032_vm0 = vmmov 0   ;;  %s2591_s1 = inlined_call_operand.vmem [shape: bf16[1024,128], index: 1, kind: input, shape index: {}]   ;;  %s2592_s0 = inlined_call_operand.vmem [shape: f32[16,1024], index: 0, kind: input, shape index: {}]   ;;  %s2593_s3 = inlined_call_operand.vmem [shape: bf16[128,128], index: 3, kind: input, shape index: {}]   ;;  %s2594_s2 = inlined_call_operand.vmem [shape: f32[1,128], index: 2, kind: input, shape index: {}]   ;;  %s2595_s17 = inlined_call_operand.vmem [shape: f32[16,384], index: 17, kind: output, shape index: {}]   ;;  %s2596_s6 = inlined_call_operand.vmem [shape: bf16[128,128], index: 6, kind: input, shape index: {}]   ;;  %s2597_s4 = inlined_call_operand.vmem [shape: f32[1,128], index: 4, kind: input, shape index: {}]   ;;  %s2598_s5 = inlined_call_operand.vmem [shape: f32[1,128], index: 5, kind: input, shape index: {}]   ;;  %s2599_s9 = inlined_call_operand.vmem [shape: bf16[128,128], index: 9, kind: input, shape index: {}]   ;;  %s2600_s7 = inlined_call_operand.vmem [shape: f32[1,128], index: 7, kind: input, shape index: {}]   ;;  %s2601_s8 = inlined_call_operand.vmem [shape: f32[1,128], index: 8, kind: input, shape index: {}]   ;;  %s2602_s12 = inlined_call_operand.vmem [shape: bf16[128,128], index: 12, kind: input, shape index: {}]   ;;  %s2603_s10 = inlined_call_operand.vmem [shape: f32[1,128], index: 10, kind: input, shape index: {}]   ;;  %s2604_s11 = inlined_call_operand.vmem [shape: f32[1,128], index: 11, kind: input, shape index: {}]   ;;  %s2605_s15 = inlined_call_operand.vmem [shape: bf16[128,128], index: 15, kind: input, shape index: {}]   ;;  %s2606_s13 = inlined_call_operand.vmem [shape: f32[1,128], index: 13, kind: input, shape index: {}]   ;;  %s2607_s14 = inlined_call_operand.vmem [shape: f32[1,128], index: 14, kind: input, shape index: {}]   ;;  %s2608_s16 = inlined_call_operand.vmem [shape: f32[1,128], index: 16, kind: input, shape index: {}]  }
   0x1   :  { %2611 = sst [smem:[#allocation2_spill]] %s2591_s1 }
   0x2   :  { %2612 = sst [smem:[#allocation3_spill]] %s2592_s0  ;;  %s2613_s26 = sld [smem:[#allocation2_spill]] }
   0x3   :  { %s2614_s20 = sld [smem:[#allocation3_spill]] }
   0x8   :  { %v1911_v0 = vld [vmem:[%s2613_s26 + $0x40] sm:$0xff]   ;;  %v1915_v4 = vld [vmem:[%s2613_s26 + $0x48] sm:$0xff]   ;;  %v1919_v8 = vld [vmem:[%s2613_s26 + $0x50] sm:$0xff]  }
   0x9   :  { %v1912_v1 = vld [vmem:[%s2613_s26 + $0xc0] sm:$0xff]   ;;  %1676 = vmatprep.subr.bf16.mxu0 %v1911_v0  ;;  %v1916_v5 = vld [vmem:[%s2613_s26 + $0xc8] sm:$0xff]   ;;  %v1920_v9 = vld [vmem:[%s2613_s26 + $0xd0] sm:$0xff]  }
   0xa   :  { %v1913_v2 = vld [vmem:[%s2613_s26] sm:$0xff]   ;;  %1698 = vmatprep.subr.bf16.mxu1 %v1912_v1  ;;  %v1917_v6 = vld [vmem:[%s2613_s26 + $0x8] sm:$0xff]   ;;  %v1921_v10 = vld [vmem:[%s2613_s26 + $0x10] sm:$0xff]  }
   0xb   :  { %v1914_v3 = vld [vmem:[%s2613_s26 + $0x80] sm:$0xff]   ;;  %1677 = vmatpush3.bf16.msra.mxu0 %v1913_v2  ;;  %v1918_v7 = vld [vmem:[%s2613_s26 + $0x88] sm:$0xff]   ;;  %v1922_v11 = vld [vmem:[%s2613_s26 + $0x90] sm:$0xff]  }
   0xc   :  { %1699 = vmatpush3.bf16.msra.mxu1 %v1914_v3  ;;  %1678 = vmatprep.subr.bf16.mxu0 %v1915_v4  ;;  %v1923_v12 = vld [vmem:[%s2613_s26 + $0x58] sm:$0xff]   ;;  %v1927_v16 = vld [vmem:[%s2613_s26 + $0x60] sm:$0xff]   ;;  %v1931_v20 = vld [vmem:[%s2613_s26 + $0x68] sm:$0xff]  }
   0xd   :  { %1700 = vmatprep.subr.bf16.mxu1 %v1916_v5  ;;  %v1924_v13 = vld [vmem:[%s2613_s26 + $0xd8] sm:$0xff]   ;;  %v1928_v17 = vld [vmem:[%s2613_s26 + $0xe0] sm:$0xff]   ;;  %v1932_v21 = vld [vmem:[%s2613_s26 + $0xe8] sm:$0xff]  }
   0xe   :  { %v1925_v14 = vld [vmem:[%s2613_s26 + $0x18] sm:$0xff]   ;;  %v1929_v18 = vld [vmem:[%s2613_s26 + $0x20] sm:$0xff]   ;;  %v1933_v22 = vld [vmem:[%s2613_s26 + $0x28] sm:$0xff]  }
   0xf   :  { %1679 = vmatpush3.bf16.msra.mxu0 %v1917_v6  ;;  %v1926_v15 = vld [vmem:[%s2613_s26 + $0x98] sm:$0xff]   ;;  %v1930_v19 = vld [vmem:[%s2613_s26 + $0xa0] sm:$0xff]   ;;  %v1934_v23 = vld [vmem:[%s2613_s26 + $0xa8] sm:$0xff]  }
  0x10   :  { %1701 = vmatpush3.bf16.msra.mxu1 %v1918_v7  ;;  %1680 = vmatprep.subr.bf16.mxu0 %v1919_v8  ;;  %v1935_v24 = vld [vmem:[%s2613_s26 + $0x70] sm:$0xff]   ;;  %v1939_v28 = vld [vmem:[%s2613_s26 + $0x78] sm:$0xff]   ;;  %v58_v32 = vld [vmem:[%s2614_s20 + $0x8] sm:$0xff] }
  0x11   :  { %1702 = vmatprep.subr.bf16.mxu1 %v1920_v9  ;;  %v1936_v25 = vld [vmem:[%s2613_s26 + $0xf0] sm:$0xff]   ;;  %v1940_v29 = vld [vmem:[%s2613_s26 + $0xf8] sm:$0xff]   ;;  %v66_v33 = vld [vmem:[%s2614_s20 + $0x48] sm:$0xff] }
  0x12   :  { %v1937_v26 = vld [vmem:[%s2613_s26 + $0x30] sm:$0xff]   ;;  %v1941_v30 = vld [vmem:[%s2613_s26 + $0x38] sm:$0xff]   ;;  %v74_v35 = vpack.c.bf16 %v66_v33, %v58_v32  ;;  %v57_v37 = vld [vmem:[%s2614_s20] sm:$0xff] }
  0x13   :  { %1681 = vmatpush3.bf16.msra.mxu0 %v1921_v10  ;;  %v1938_v27 = vld [vmem:[%s2613_s26 + $0xb0] sm:$0xff]   ;;  %v1942_v31 = vld [vmem:[%s2613_s26 + $0xb8] sm:$0xff]   ;;  %v65_v38 = vld [vmem:[%s2614_s20 + $0x40] sm:$0xff] }
  0x14   :  { %1703 = vmatpush3.bf16.msra.mxu1 %v1922_v11  ;;  %1682 = vmatprep.subr.bf16.mxu0 %v1923_v12  ;;  %v60_v34 = vld [vmem:[%s2614_s20 + $0x18] sm:$0xff]  ;;  %v73_v40 = vpack.c.bf16 %v65_v38, %v57_v37  ;;  %v59_v41 = vld [vmem:[%s2614_s20 + $0x10] sm:$0xff]  ;;  %v1943_v44 = vld [vmem:[%s2613_s26 + $0x140] sm:$0xff]  }
  0x15   :  { %1704 = vmatprep.subr.bf16.mxu1 %v1924_v13  ;;  %v68_v36 = vld [vmem:[%s2614_s20 + $0x58] sm:$0xff]  ;;  %v67_v42 = vld [vmem:[%s2614_s20 + $0x50] sm:$0xff]  ;;  %632 = vmatprep.mubr.bf16.mxu0 %v74_v35  ;;  %v1944_v45 = vld [vmem:[%s2613_s26 + $0x1c0] sm:$0xff]  }
  0x16   :  { %v76_v39 = vpack.c.bf16 %v68_v36, %v60_v34  ;;  %v75_v43 = vpack.c.bf16 %v67_v42, %v59_v41  ;;  %v1945_v46 = vld [vmem:[%s2613_s26 + $0x100] sm:$0xff]   ;;  %v1947_v48 = vld [vmem:[%s2613_s26 + $0x148] sm:$0xff]   ;;  %v1951_v52 = vld [vmem:[%s2613_s26 + $0x150] sm:$0xff]  }
  0x17   :  { %1683 = vmatpush3.bf16.msra.mxu0 %v1925_v14  ;;  %v1946_v47 = vld [vmem:[%s2613_s26 + $0x180] sm:$0xff]   ;;  %v1948_v49 = vld [vmem:[%s2613_s26 + $0x1c8] sm:$0xff]   ;;  %v1952_v53 = vld [vmem:[%s2613_s26 + $0x1d0] sm:$0xff]  }
  0x18   :  { %1705 = vmatpush3.bf16.msra.mxu1 %v1926_v15  ;;  %1684 = vmatprep.subr.bf16.mxu0 %v1927_v16  ;;  %v1949_v50 = vld [vmem:[%s2613_s26 + $0x108] sm:$0xff]   ;;  %v1953_v54 = vld [vmem:[%s2613_s26 + $0x110] sm:$0xff]   ;;  %v1955_v56 = vld [vmem:[%s2613_s26 + $0x158] sm:$0xff]  }
  0x19   :  { %1706 = vmatprep.subr.bf16.mxu1 %v1928_v17  ;;  %673 = vmatprep.mubr.bf16.mxu1 %v76_v39  ;;  %v1950_v51 = vld [vmem:[%s2613_s26 + $0x188] sm:$0xff]   ;;  %v1954_v55 = vld [vmem:[%s2613_s26 + $0x190] sm:$0xff]   ;;  %v1956_v57 = vld [vmem:[%s2613_s26 + $0x1d8] sm:$0xff]  }
  0x1a   :  { %v1957_v58 = vld [vmem:[%s2613_s26 + $0x118] sm:$0xff]   ;;  %v1959_v60 = vld [vmem:[%s2613_s26 + $0x160] sm:$0xff]   ;;  %v1963_v0 = vld [vmem:[%s2613_s26 + $0x168] sm:$0xff]  }
  0x1b   :  { %1685 = vmatpush3.bf16.msra.mxu0 %v1929_v18  ;;  %v1958_v59 = vld [vmem:[%s2613_s26 + $0x198] sm:$0xff]   ;;  %v1960_v61 = vld [vmem:[%s2613_s26 + $0x1e0] sm:$0xff]   ;;  %v1964_v1 = vld [vmem:[%s2613_s26 + $0x1e8] sm:$0xff]  }
  0x1c   :  { %1707 = vmatpush3.bf16.msra.mxu1 %v1930_v19  ;;  %1686 = vmatprep.subr.bf16.mxu0 %v1931_v20  ;;  %v1961_v62 = vld [vmem:[%s2613_s26 + $0x120] sm:$0xff]   ;;  %v1965_v2 = vld [vmem:[%s2613_s26 + $0x128] sm:$0xff]   ;;  %v1967_v4 = vld [vmem:[%s2613_s26 + $0x170] sm:$0xff]  }
  0x1d   :  { %1708 = vmatprep.subr.bf16.mxu1 %v1932_v21  ;;  %v1962_v63 = vld [vmem:[%s2613_s26 + $0x1a0] sm:$0xff]   ;;  %v1966_v3 = vld [vmem:[%s2613_s26 + $0x1a8] sm:$0xff]   ;;  %v1968_v5 = vld [vmem:[%s2613_s26 + $0x1f0] sm:$0xff]  }
  0x1e   :  { %v1969_v6 = vld [vmem:[%s2613_s26 + $0x130] sm:$0xff]   ;;  %v1971_v8 = vld [vmem:[%s2613_s26 + $0x178] sm:$0xff]   ;;  %v62_v12 = vld [vmem:[%s2614_s20 + $0x28] sm:$0xff] }
  0x1f   :  { %1687 = vmatpush3.bf16.msra.mxu0 %v1933_v22  ;;  %v1970_v7 = vld [vmem:[%s2613_s26 + $0x1b0] sm:$0xff]   ;;  %v1972_v9 = vld [vmem:[%s2613_s26 + $0x1f8] sm:$0xff]   ;;  %v70_v13 = vld [vmem:[%s2614_s20 + $0x68] sm:$0xff] }
  0x20   :  { %1709 = vmatpush3.bf16.msra.mxu1 %v1934_v23  ;;  %1688 = vmatprep.subr.bf16.mxu0 %v1935_v24  ;;  %v1973_v10 = vld [vmem:[%s2613_s26 + $0x138] sm:$0xff]   ;;  %v78_v16 = vpack.c.bf16 %v70_v13, %v62_v12  ;;  %v61_v18 = vld [vmem:[%s2614_s20 + $0x20] sm:$0xff]  ;;  %v63_v20 = vld [vmem:[%s2614_s20 + $0x30] sm:$0xff]  ;;  %v2031_v24 = vmov 0.0  }
  0x21   :  { %1710 = vmatprep.subr.bf16.mxu1 %v1936_v25  ;;  %v1974_v11 = vld [vmem:[%s2613_s26 + $0x1b8] sm:$0xff]   ;;  %v69_v19 = vld [vmem:[%s2614_s20 + $0x60] sm:$0xff]  ;;  %v71_v22 = vld [vmem:[%s2614_s20 + $0x70] sm:$0xff] }
  0x22   :  { %v64_v14 = vld [vmem:[%s2614_s20 + $0x38] sm:$0xff]  ;;  %v77_v21 = vpack.c.bf16 %v69_v19, %v61_v18  ;;  %v79_v23 = vpack.c.bf16 %v71_v22, %v63_v20  ;;  %v1975_v25 = vld [vmem:[%s2593_s3] sm:$0xff]  }
  0x23   :  { %1689 = vmatpush3.bf16.msra.mxu0 %v1937_v26  ;;  %v72_v15 = vld [vmem:[%s2614_s20 + $0x78] sm:$0xff]  ;;  %v1976_v26 = vld [vmem:[%s2593_s3 + $0x8] sm:$0xff]   ;;  %v1566_v35 = vld [vmem:[%s2594_s2] ss:$0 sm:$0xff] }
  0x24   :  { %1711 = vmatpush3.bf16.msra.mxu1 %v1938_v27  ;;  %1690 = vmatprep.subr.bf16.mxu0 %v1939_v28  ;;  %v80_v17 = vpack.c.bf16 %v72_v15, %v64_v14  ;;  %v1977_v27 = vld [vmem:[%s2593_s3 + $0x10] sm:$0xff]   ;;  %v1978_v28 = vld [vmem:[%s2593_s3 + $0x18] sm:$0xff]  }
  0x25   :  { %1712 = vmatprep.subr.bf16.mxu1 %v1940_v29  ;;  %v1979_v29 = vld [vmem:[%s2593_s3 + $0x20] sm:$0xff]   ;;  %v1982_v32 = vld [vmem:[%s2593_s3 + $0x38] sm:$0xff]  }
  0x27   :  { %1691 = vmatpush3.bf16.msra.mxu0 %v1941_v30  ;;  %v1980_v30 = vld [vmem:[%s2593_s3 + $0x28] sm:$0xff]  }
  0x28   :  { %1713 = vmatpush3.bf16.msra.mxu1 %v1942_v31  ;;  %1720 = vmatprep.subr.bf16.mxu0 %v1943_v44  ;;  %v1981_v31 = vld [vmem:[%s2593_s3 + $0x30] sm:$0xff]  }
  0x29   :  { %1742 = vmatprep.subr.bf16.mxu1 %v1944_v45 }
  0x2a   :  { %633 = vmatmul.mubr.bf16.vlgmr.msra.gmra.mrb[0].mxu0 %v73_v40 }
  0x2b   :  { %674 = vmatmul.mubr.bf16.vlgmr.msra.gmra.mrb[0].mxu1 %v75_v43  ;;  %1721 = vmatpush3.bf16.msra.mxu0 %v1945_v46 }
  0x2c   :  { %1743 = vmatpush3.bf16.msra.mxu1 %v1946_v47  ;;  %1722 = vmatprep.subr.bf16.mxu0 %v1947_v48 }
  0x2d   :  { %1744 = vmatprep.subr.bf16.mxu1 %v1948_v49  ;;  %714 = vmatprep.mubr.bf16.mxu0 %v78_v16 }
  0x2e   :  { %755 = vmatprep.mubr.bf16.mxu1 %v80_v17 }
  0x2f   :  { %1723 = vmatpush3.bf16.msra.mxu0 %v1949_v50 }
  0x30   :  { %1745 = vmatpush3.bf16.msra.mxu1 %v1950_v51  ;;  %1724 = vmatprep.subr.bf16.mxu0 %v1951_v52 }
  0x31   :  { %1746 = vmatprep.subr.bf16.mxu1 %v1952_v53 }
  0x33   :  { %1725 = vmatpush3.bf16.msra.mxu0 %v1953_v54 }
  0x34   :  { %1747 = vmatpush3.bf16.msra.mxu1 %v1954_v55  ;;  %1726 = vmatprep.subr.bf16.mxu0 %v1955_v56 }
  0x35   :  { %1748 = vmatprep.subr.bf16.mxu1 %v1956_v57 }
  0x37   :  { %1727 = vmatpush3.bf16.msra.mxu0 %v1957_v58 }
  0x38   :  { %1749 = vmatpush3.bf16.msra.mxu1 %v1958_v59  ;;  %1728 = vmatprep.subr.bf16.mxu0 %v1959_v60 }
  0x39   :  { %1750 = vmatprep.subr.bf16.mxu1 %v1960_v61 }
  0x3b   :  { %1729 = vmatpush3.bf16.msra.mxu0 %v1961_v62 }
  0x3c   :  { %1751 = vmatpush3.bf16.msra.mxu1 %v1962_v63  ;;  %1730 = vmatprep.subr.bf16.mxu0 %v1963_v0 }
  0x3d   :  { %1752 = vmatprep.subr.bf16.mxu1 %v1964_v1 }
  0x3f   :  { %1731 = vmatpush3.bf16.msra.mxu0 %v1965_v2 }
  0x40   :  { %1753 = vmatpush3.bf16.msra.mxu1 %v1966_v3  ;;  %1732 = vmatprep.subr.bf16.mxu0 %v1967_v4  ;;  %v1983_v3 = vld [vmem:[%s2596_s6] sm:$0xff]   ;;  %v1984_v4 = vld [vmem:[%s2596_s6 + $0x8] sm:$0xff]  }
  0x41   :  { %1754 = vmatprep.subr.bf16.mxu1 %v1968_v5  ;;  %v1985_v5 = vld [vmem:[%s2596_s6 + $0x10] sm:$0xff]  }
  0x43   :  { %1733 = vmatpush3.bf16.msra.mxu0 %v1969_v6  ;;  %v1986_v6 = vld [vmem:[%s2596_s6 + $0x18] sm:$0xff]  }
  0x44   :  { %1755 = vmatpush3.bf16.msra.mxu1 %v1970_v7  ;;  %1734 = vmatprep.subr.bf16.mxu0 %v1971_v8  ;;  %v1987_v7 = vld [vmem:[%s2596_s6 + $0x20] sm:$0xff]   ;;  %v1988_v8 = vld [vmem:[%s2596_s6 + $0x28] sm:$0xff]  }
  0x45   :  { %1756 = vmatprep.subr.bf16.mxu1 %v1972_v9  ;;  %v1989_v9 = vld [vmem:[%s2596_s6 + $0x30] sm:$0xff]  }
  0x47   :  { %1735 = vmatpush3.bf16.msra.mxu0 %v1973_v10  ;;  %v1990_v10 = vld [vmem:[%s2596_s6 + $0x38] sm:$0xff]  }
  0x48   :  { %1757 = vmatpush3.bf16.msra.mxu1 %v1974_v11  ;;  %1809 = vmatprep.subr.bf16.mxu0 %v2031_v24 }
  0x49   :  { %1829 = vmatprep.subr.bf16.mxu1 %v2031_v24 }
  0x4a   :  { %715 = vmatmul.mubr.bf16.vlgmr.msra.gmra.mrb[4].mxu0 %v77_v21 }
  0x4b   :  { %756 = vmatmul.mubr.bf16.vlgmr.msra.gmra.mrb[4].mxu1 %v79_v23  ;;  %1810 = vmatpush3.bf16.msra.mxu0 %v1975_v25 }
  0x4c   :  { %1811 = vmatprep.subr.bf16.mxu0 %v2031_v24  ;;  %1825 = vmatprep.mubr.msk.bf16.mxu0 %vm2032_vm0, %v2031_v24 }
  0x4d   :  { %1845 = vmatprep.mubr.msk.bf16.mxu1 %vm2032_vm0, %v2031_v24  ;;  %1830 = vmatpush3.bf16.msra.mxu1 %v1983_v3 }
  0x4e   :  { %1831 = vmatprep.subr.bf16.mxu1 %v2031_v24 }
  0x4f   :  { %1812 = vmatpush3.bf16.msra.mxu0 %v1976_v26 }
  0x50   :  { %1813 = vmatprep.subr.bf16.mxu0 %v2031_v24 }
  0x51   :  { %1832 = vmatpush3.bf16.msra.mxu1 %v1984_v4  ;;  %v1991_v4 = vld [vmem:[%s2599_s9] sm:$0xff]  }
  0x52   :  { %1833 = vmatprep.subr.bf16.mxu1 %v2031_v24 }
  0x53   :  { %1814 = vmatpush3.bf16.msra.mxu0 %v1977_v27 }
  0x54   :  { %1815 = vmatprep.subr.bf16.mxu0 %v2031_v24 }
  0x55   :  { %1834 = vmatpush3.bf16.msra.mxu1 %v1985_v5  ;;  %v1992_v5 = vld [vmem:[%s2599_s9 + $0x8] sm:$0xff]  }
  0x56   :  { %1835 = vmatprep.subr.bf16.mxu1 %v2031_v24 }
  0x57   :  { %1816 = vmatpush3.bf16.msra.mxu0 %v1978_v28 }
  0x58   :  { %1817 = vmatprep.subr.bf16.mxu0 %v2031_v24 }
  0x59   :  { %1836 = vmatpush3.bf16.msra.mxu1 %v1986_v6  ;;  %v1993_v6 = vld [vmem:[%s2599_s9 + $0x10] sm:$0xff]  }
  0x5a   :  { %1837 = vmatprep.subr.bf16.mxu1 %v2031_v24 }
  0x5b   :  { %1818 = vmatpush3.bf16.msra.mxu0 %v1979_v29 }
  0x5c   :  { %1819 = vmatprep.subr.bf16.mxu0 %v2031_v24 }
  0x5d   :  { %1838 = vmatpush3.bf16.msra.mxu1 %v1987_v7  ;;  %v1994_v7 = vld [vmem:[%s2599_s9 + $0x18] sm:$0xff]  }
  0x5e   :  { %1839 = vmatprep.subr.bf16.mxu1 %v2031_v24 }
  0x5f   :  { %1820 = vmatpush3.bf16.msra.mxu0 %v1980_v30 }
  0x60   :  { %1821 = vmatprep.subr.bf16.mxu0 %v2031_v24 }
  0x61   :  { %1840 = vmatpush3.bf16.msra.mxu1 %v1988_v8  ;;  %v1995_v8 = vld [vmem:[%s2599_s9 + $0x20] sm:$0xff]  }
  0x62   :  { %1841 = vmatprep.subr.bf16.mxu1 %v2031_v24 }
  0x63   :  { %1822 = vmatpush3.bf16.msra.mxu0 %v1981_v31 }
  0x64   :  { %1823 = vmatprep.subr.bf16.mxu0 %v2031_v24 }
  0x65   :  { %1842 = vmatpush3.bf16.msra.mxu1 %v1989_v9  ;;  %v1996_v9 = vld [vmem:[%s2599_s9 + $0x28] sm:$0xff]  }
  0x66   :  { %1843 = vmatprep.subr.bf16.mxu1 %v2031_v24 }
  0x67   :  { %1824 = vmatpush3.bf16.msra.mxu0 %v1982_v32 }
  0x68   :  { %1849 = vmatprep.subr.bf16.mxu0 %v2031_v24 }
  0x69   :  { %1844 = vmatpush3.bf16.msra.mxu1 %v1990_v10  ;;  %v1997_v10 = vld [vmem:[%s2599_s9 + $0x30] sm:$0xff]  }
  0x6a   :  { %1869 = vmatprep.subr.bf16.mxu1 %v2031_v24 }
  0xfd   :  { %v1692_v33 = vpop.f32.mrb[0].mxu0 }
  0xfe   :  { %v1714_v34 = vpop.f32.mrb[0].mxu1  ;;  %v1693_v36 = vpop.f32.mrb[1].mxu0 }
  0xff   :  { %v1694_v37 = vadd.f32 %v1693_v36, %v1692_v33  ;;  %v1715_v38 = vpop.f32.mrb[1].mxu1  ;;  %v1695_v39 = vpop.f32.mrb[2].mxu0 }
 0x100   :  { %v1716_v40 = vadd.f32 %v1715_v38, %v1714_v34  ;;  %v1717_v41 = vpop.f32.mrb[2].mxu1  ;;  %v1696_v42 = vpop.f32.mrb[3].mxu0 }
 0x101   :  { %v635_v43 = vadd.f32 %v1694_v37, %v1566_v35  ;;  %v1697_v44 = vadd.f32 %v1696_v42, %v1695_v39  ;;  %v1718_v45 = vpop.f32.mrb[3].mxu1 }
 0x102   :  { %v1719_v46 = vadd.f32 %v1718_v45, %v1717_v41 }
 0x103   :  { %v676_v47 = vadd.f32 %v1716_v40, %v635_v43  ;;  %v638_v48 = vadd.f32 %v1697_v44, %v1566_v35 }
 0x105   :  { %v679_v49 = vadd.f32 %v1719_v46, %v638_v48 }
 0x11d   :  { %v1736_v50 = vpop.f32.mrb[4].mxu0 }
 0x11e   :  { %v1758_v51 = vpop.f32.mrb[4].mxu1  ;;  %v1737_v52 = vpop.f32.mrb[5].mxu0 }
 0x11f   :  { %v1738_v53 = vadd.f32 %v1737_v52, %v1736_v50  ;;  %v1759_v54 = vpop.f32.mrb[5].mxu1  ;;  %v1739_v55 = vpop.f32.mrb[6].mxu0  ;;  %v893_v50 = vlaneseq  ;;  %v870_v52 = vld [vmem:[%s2597_s4] sm:$0x1] }
 0x120   :  { %v1760_v56 = vadd.f32 %v1759_v54, %v1758_v51  ;;  %v1761_v57 = vpop.f32.mrb[6].mxu1  ;;  %v1740_v58 = vpop.f32.mrb[7].mxu0 }
 0x121   :  { %v717_v59 = vadd.f32 %v1738_v53, %v676_v47  ;;  %v1741_v60 = vadd.f32 %v1740_v58, %v1739_v55  ;;  %v1762_v61 = vpop.f32.mrb[7].mxu1  ;;  %v894_v51 = vshrl.u32 %v893_v50, 7 }
 0x122   :  { %v1763_v62 = vadd.f32 %v1762_v61, %v1761_v57 }
 0x123   :  { %v758_v63 = vadd.f32 %v1760_v56, %v717_v59  ;;  %v720_v0 = vadd.f32 %v1741_v60, %v679_v49  ;;  %v2447_v53 = vsub.s32 0, %v894_v51  ;;  %v1639_v59 = vld [vmem:[%s2598_s5] ss:$0 sm:$0xff] }
 0x124   :  { %v1041_v51 = vld [vmem:[%s2600_s7] sm:$0x1] }
 0x125   :  { %1560 = vst [vmem:[%s2595_s17 + $0x10] sm:$0xff] %v758_v63  ;;  %v761_v1 = vadd.f32 %v1763_v62, %v720_v0 }
 0x127   :  { %v764_v2 = vpack.c.bf16 %v761_v1, %v758_v63  ;;  %1561 = vst [vmem:[%s2595_s17 + $0x28] sm:$0xff] %v761_v1 }
 0x129   :  { %1826 = vmatmul.mubr.bf16.vlgmr.msra.gmra.mrb[8].mxu0 %v764_v2 }
 0x12a   :  { %1865 = vmatprep.mubr.msk.bf16.mxu0 %vm2032_vm0, %v2031_v24  ;;  %1850 = vmatpush3.bf16.msra.mxu0 %v1991_v4  ;;  %v2000_v4 = vld [vmem:[%s2602_s12 + $0x8] sm:$0xff]  }
 0x12b   :  { %1851 = vmatprep.subr.bf16.mxu0 %v2031_v24 }
 0x12e   :  { %1852 = vmatpush3.bf16.msra.mxu0 %v1992_v5  ;;  %v2001_v5 = vld [vmem:[%s2602_s12 + $0x10] sm:$0xff]  }
 0x12f   :  { %1853 = vmatprep.subr.bf16.mxu0 %v2031_v24 }
 0x132   :  { %1854 = vmatpush3.bf16.msra.mxu0 %v1993_v6  ;;  %v2002_v6 = vld [vmem:[%s2602_s12 + $0x18] sm:$0xff]  }
 0x133   :  { %1855 = vmatprep.subr.bf16.mxu0 %v2031_v24 }
 0x136   :  { %1856 = vmatpush3.bf16.msra.mxu0 %v1994_v7  ;;  %v2003_v7 = vld [vmem:[%s2602_s12 + $0x20] sm:$0xff]  }
 0x137   :  { %1857 = vmatprep.subr.bf16.mxu0 %v2031_v24 }
 0x13a   :  { %1858 = vmatpush3.bf16.msra.mxu0 %v1995_v8  ;;  %v2004_v8 = vld [vmem:[%s2602_s12 + $0x28] sm:$0xff]  }
 0x13b   :  { %1859 = vmatprep.subr.bf16.mxu0 %v2031_v24 }
 0x13e   :  { %1860 = vmatpush3.bf16.msra.mxu0 %v1996_v9  ;;  %v2005_v9 = vld [vmem:[%s2602_s12 + $0x30] sm:$0xff]  }
 0x13f   :  { %1861 = vmatprep.subr.bf16.mxu0 %v2031_v24 }
 0x142   :  { %1862 = vmatpush3.bf16.msra.mxu0 %v1997_v10  ;;  %v2006_v10 = vld [vmem:[%s2602_s12 + $0x38] sm:$0xff]  }
 0x143   :  { %1863 = vmatprep.subr.bf16.mxu0 %v2031_v24 }
 0x1fc   :  { %v863_v11 = vpop.f32.mrb[8].mxu0 }
 0x1fd   :  { %v872_v12 = vrot.slane %v863_v11, 4  ;;  %v1827_v13 = vpop.f32.mrb[9].mxu0 }
 0x1fe   :  { %v866_v14 = vpop.f32.mrb[10].mxu0 }
 0x1ff   :  { %v873_v15 = vadd.f32 %v872_v12, %v863_v11  ;;  %v906_v16 = vrot.slane %v866_v14, 4  ;;  %v1828_v17 = vpop.f32.mrb[11].mxu0 }
 0x201   :  { %v874_v18 = vrot.slane %v873_v15, 2  ;;  %v907_v19 = vadd.f32 %v906_v16, %v866_v14 }
 0x203   :  { %v875_v20 = vadd.f32 %v874_v18, %v873_v15  ;;  %v908_v21 = vrot.slane %v907_v19, 2 }
 0x205   :  { %v876_v22 = vrot.slane %v875_v20, 1  ;;  %v909_v23 = vadd.f32 %v908_v21, %v907_v19 }
 0x207   :  { %v877_v25 = vadd.f32 %v876_v22, %v875_v20  ;;  %v910_v26 = vrot.slane %v909_v23, 1 }
 0x209   :  { %v879_v27 = vmul.f32 0.125, %v877_v25  ;;  %v911_v28 = vadd.f32 %v910_v26, %v909_v23 }
 0x20b   :  { %v880_v29 = vsub.f32 %v863_v11, %v879_v27  ;;  %v912_v30 = vmul.f32 0.125, %v911_v28  ;;  %v1998_v11 = vld [vmem:[%s2599_s9 + $0x38] sm:$0xff]  }
 0x20c   :  { %1864 = vmatpush3.bf16.msra.mxu0 %v1998_v11 }
 0x20d   :  { %v881_v31 = vmul.f32 %v880_v29, %v880_v29  ;;  %v913_v32 = vsub.f32 %v866_v14, %v912_v30  ;;  %1889 = vmatprep.subr.bf16.mxu0 %v2031_v24 }
 0x20f   :  { %v882_v33 = vrot.slane %v881_v31, 4  ;;  %v914_v34 = vmul.f32 %v913_v32, %v913_v32 }
 0x211   :  { %v883_v35 = vadd.f32 %v882_v33, %v881_v31  ;;  %v915_v36 = vrot.slane %v914_v34, 4 }
 0x213   :  { %v884_v37 = vrot.slane %v883_v35, 2  ;;  %v916_v38 = vadd.f32 %v915_v36, %v914_v34 }
 0x215   :  { %v885_v39 = vadd.f32 %v884_v37, %v883_v35  ;;  %v917_v40 = vrot.slane %v916_v38, 2 }
 0x217   :  { %v886_v41 = vrot.slane %v885_v39, 1  ;;  %v918_v42 = vadd.f32 %v917_v40, %v916_v38 }
 0x219   :  { %v887_v43 = vadd.f32 %v886_v41, %v885_v39  ;;  %v919_v44 = vrot.slane %v918_v42, 1 }
 0x21b   :  { %v888_v45 = vmul.f32 0.125, %v887_v43  ;;  %v920_v46 = vadd.f32 %v919_v44, %v918_v42 }
 0x21d   :  { %v889_v47 = vadd.f32 1e-05, %v888_v45  ;;  %v921_v48 = vmul.f32 0.125, %v920_v46 }
 0x21f   :  { %2015 = vrsqrt.f32 %v889_v47  ;;  %v922_v49 = vadd.f32 1e-05, %v921_v48 }
 0x221   :  { %2017 = vrsqrt.f32 %v922_v49 }
 0x229   :  { %v2016_v54 = vpop.eup %2015 }
 0x22a   :  { %v891_v55 = vmul.f32 %v2016_v54, %v870_v52 }
 0x22b   :  { %v2018_v56 = vpop.eup %2017 }
 0x22c   :  { %v896_v57 = vrot.slane %v891_v55, %v2447_v53  ;;  %v924_v58 = vmul.f32 %v2018_v56, %v870_v52 }
 0x22e   :  { %v898_v60 = vmul.f32 %v896_v57, %v880_v29  ;;  %v929_v61 = vrot.slane %v924_v58, %v2447_v53  ;;  %v1648_v58 = vld [vmem:[%s2601_s8] ss:$0 sm:$0xff] }
 0x230   :  { %v905_v62 = vadd.f32 %v1639_v59, %v898_v60  ;;  %v931_v63 = vmul.f32 %v929_v61, %v913_v32 }
 0x232   :  { %v932_v0 = vadd.f32 %v1639_v59, %v931_v63  ;;  %v933_v1 = vmax.f32 %v905_v62, 0.0 }
 0x234   :  { %v934_v2 = vmax.f32 %v932_v0, 0.0 }
 0x236   :  { %v935_v3 = vpack.c.bf16 %v934_v2, %v933_v1 }
 0x238   :  { %1846 = vmatmul.mubr.bf16.vlgmr.msra.gmra.mrb[8].mxu1 %v935_v3  ;;  %v1999_v3 = vld [vmem:[%s2602_s12] sm:$0xff]  }
 0x239   :  { %1885 = vmatprep.mubr.msk.bf16.mxu1 %vm2032_vm0, %v2031_v24  ;;  %1870 = vmatpush3.bf16.msra.mxu1 %v1999_v3  ;;  %v2010_v3 = vld [vmem:[%s2605_s15 + $0x18] sm:$0xff]  }
 0x23a   :  { %1871 = vmatprep.subr.bf16.mxu1 %v2031_v24 }
 0x23d   :  { %1872 = vmatpush3.bf16.msra.mxu1 %v2000_v4  ;;  %v2011_v4 = vld [vmem:[%s2605_s15 + $0x20] sm:$0xff]  }
 0x23e   :  { %1873 = vmatprep.subr.bf16.mxu1 %v2031_v24 }
 0x241   :  { %1874 = vmatpush3.bf16.msra.mxu1 %v2001_v5  ;;  %v2012_v5 = vld [vmem:[%s2605_s15 + $0x28] sm:$0xff]  }
 0x242   :  { %1875 = vmatprep.subr.bf16.mxu1 %v2031_v24 }
 0x245   :  { %1876 = vmatpush3.bf16.msra.mxu1 %v2002_v6  ;;  %v2013_v6 = vld [vmem:[%s2605_s15 + $0x30] sm:$0xff]  }
 0x246   :  { %1877 = vmatprep.subr.bf16.mxu1 %v2031_v24 }
 0x249   :  { %1878 = vmatpush3.bf16.msra.mxu1 %v2003_v7  ;;  %v2014_v7 = vld [vmem:[%s2605_s15 + $0x38] sm:$0xff]  }
 0x24a   :  { %1879 = vmatprep.subr.bf16.mxu1 %v2031_v24 }
 0x24d   :  { %1880 = vmatpush3.bf16.msra.mxu1 %v2004_v8 }
 0x24e   :  { %1881 = vmatprep.subr.bf16.mxu1 %v2031_v24 }
 0x251   :  { %1882 = vmatpush3.bf16.msra.mxu1 %v2005_v9 }
 0x252   :  { %1883 = vmatprep.subr.bf16.mxu1 %v2031_v24 }
 0x255   :  { %1884 = vmatpush3.bf16.msra.mxu1 %v2006_v10 }
 0x30b   :  { %v1034_v12 = vpop.f32.mrb[8].mxu1 }
 0x30c   :  { %v1043_v13 = vrot.slane %v1034_v12, 4  ;;  %v1847_v14 = vpop.f32.mrb[9].mxu1 }
 0x30d   :  { %v1037_v15 = vpop.f32.mrb[10].mxu1 }
 0x30e   :  { %v1044_v16 = vadd.f32 %v1043_v13, %v1034_v12  ;;  %v1076_v17 = vrot.slane %v1037_v15, 4  ;;  %v1848_v18 = vpop.f32.mrb[11].mxu1 }
 0x310   :  { %v1045_v19 = vrot.slane %v1044_v16, 2  ;;  %v1077_v20 = vadd.f32 %v1076_v17, %v1037_v15 }
 0x312   :  { %v1046_v21 = vadd.f32 %v1045_v19, %v1044_v16  ;;  %v1078_v22 = vrot.slane %v1077_v20, 2 }
 0x314   :  { %v1047_v23 = vrot.slane %v1046_v21, 1  ;;  %v1079_v25 = vadd.f32 %v1078_v22, %v1077_v20 }
 0x316   :  { %v1048_v26 = vadd.f32 %v1047_v23, %v1046_v21  ;;  %v1080_v27 = vrot.slane %v1079_v25, 1 }
 0x318   :  { %v1049_v28 = vmul.f32 0.125, %v1048_v26  ;;  %v1081_v29 = vadd.f32 %v1080_v27, %v1079_v25 }
 0x31a   :  { %v1050_v30 = vsub.f32 %v1034_v12, %v1049_v28  ;;  %v1082_v31 = vmul.f32 0.125, %v1081_v29 }
 0x31c   :  { %v1051_v32 = vmul.f32 %v1050_v30, %v1050_v30  ;;  %v1083_v33 = vsub.f32 %v1037_v15, %v1082_v31 }
 0x31e   :  { %v1052_v34 = vrot.slane %v1051_v32, 4  ;;  %v1084_v35 = vmul.f32 %v1083_v33, %v1083_v33 }
 0x320   :  { %v1053_v36 = vadd.f32 %v1052_v34, %v1051_v32  ;;  %v1085_v37 = vrot.slane %v1084_v35, 4 }
 0x322   :  { %v1054_v38 = vrot.slane %v1053_v36, 2  ;;  %v1086_v39 = vadd.f32 %v1085_v37, %v1084_v35 }
 0x324   :  { %v1055_v40 = vadd.f32 %v1054_v38, %v1053_v36  ;;  %v1087_v41 = vrot.slane %v1086_v39, 2 }
 0x326   :  { %v1056_v42 = vrot.slane %v1055_v40, 1  ;;  %v1088_v43 = vadd.f32 %v1087_v41, %v1086_v39 }
 0x328   :  { %v1057_v44 = vadd.f32 %v1056_v42, %v1055_v40  ;;  %v1089_v45 = vrot.slane %v1088_v43, 1 }
 0x32a   :  { %v1058_v46 = vmul.f32 0.125, %v1057_v44  ;;  %v1090_v47 = vadd.f32 %v1089_v45, %v1088_v43 }
 0x32c   :  { %v1059_v48 = vadd.f32 1e-05, %v1058_v46  ;;  %v1091_v49 = vmul.f32 0.125, %v1090_v47 }
 0x32e   :  { %2019 = vrsqrt.f32 %v1059_v48  ;;  %v1092_v50 = vadd.f32 1e-05, %v1091_v49 }
 0x330   :  { %2021 = vrsqrt.f32 %v1092_v50  ;;  %v1211_v50 = vld [vmem:[%s2603_s10] sm:$0x1] }
 0x338   :  { %v2020_v52 = vpop.eup %2019 }
 0x339   :  { %v1061_v54 = vmul.f32 %v2020_v52, %v1041_v51 }
 0x33a   :  { %v2022_v55 = vpop.eup %2021 }
 0x33b   :  { %v1066_v56 = vrot.slane %v1061_v54, %v2447_v53  ;;  %v1094_v57 = vmul.f32 %v2022_v55, %v1041_v51 }
 0x33d   :  { %v1068_v59 = vmul.f32 %v1066_v56, %v1050_v30  ;;  %v1099_v60 = vrot.slane %v1094_v57, %v2447_v53  ;;  %v1657_v57 = vld [vmem:[%s2604_s11] ss:$0 sm:$0xff] }
 0x33f   :  { %v1075_v61 = vadd.f32 %v1648_v58, %v1068_v59  ;;  %v1101_v62 = vmul.f32 %v1099_v60, %v1083_v33 }
 0x341   :  { %v1102_v63 = vadd.f32 %v1648_v58, %v1101_v62  ;;  %v1103_v0 = vmax.f32 %v1075_v61, 0.0 }
 0x343   :  { %v1104_v1 = vmax.f32 %v1102_v63, 0.0 }
 0x345   :  { %v1105_v2 = vpack.c.bf16 %v1104_v1, %v1103_v0  ;;  %v2007_v0 = vld [vmem:[%s2605_s15] sm:$0xff]   ;;  %v2008_v1 = vld [vmem:[%s2605_s15 + $0x8] sm:$0xff]  }
 0x347   :  { %1866 = vmatmul.mubr.bf16.vlgmr.msra.gmra.mrb[12].mxu0 %v1105_v2  ;;  %v2009_v2 = vld [vmem:[%s2605_s15 + $0x10] sm:$0xff]  }
 0x348   :  { %1905 = vmatprep.mubr.msk.bf16.mxu0 %vm2032_vm0, %v2031_v24  ;;  %1890 = vmatpush3.bf16.msra.mxu0 %v2007_v0 }
 0x349   :  { %1891 = vmatprep.subr.bf16.mxu0 %v2031_v24 }
 0x34c   :  { %1892 = vmatpush3.bf16.msra.mxu0 %v2008_v1 }
 0x34d   :  { %1893 = vmatprep.subr.bf16.mxu0 %v2031_v24 }
 0x350   :  { %1894 = vmatpush3.bf16.msra.mxu0 %v2009_v2 }
 0x351   :  { %1895 = vmatprep.subr.bf16.mxu0 %v2031_v24 }
 0x354   :  { %1896 = vmatpush3.bf16.msra.mxu0 %v2010_v3 }
 0x355   :  { %1897 = vmatprep.subr.bf16.mxu0 %v2031_v24 }
 0x358   :  { %1898 = vmatpush3.bf16.msra.mxu0 %v2011_v4 }
 0x359   :  { %1899 = vmatprep.subr.bf16.mxu0 %v2031_v24 }
 0x35c   :  { %1900 = vmatpush3.bf16.msra.mxu0 %v2012_v5 }
 0x35d   :  { %1901 = vmatprep.subr.bf16.mxu0 %v2031_v24 }
 0x360   :  { %1902 = vmatpush3.bf16.msra.mxu0 %v2013_v6 }
 0x361   :  { %1903 = vmatprep.subr.bf16.mxu0 %v2031_v24 }
 0x364   :  { %1904 = vmatpush3.bf16.msra.mxu0 %v2014_v7 }
 0x41a   :  { %v1204_v11 = vpop.f32.mrb[12].mxu0 }
 0x41b   :  { %v1213_v12 = vrot.slane %v1204_v11, 4  ;;  %v1867_v13 = vpop.f32.mrb[13].mxu0 }
 0x41c   :  { %v1207_v14 = vpop.f32.mrb[14].mxu0 }
 0x41d   :  { %v1214_v15 = vadd.f32 %v1213_v12, %v1204_v11  ;;  %v1246_v16 = vrot.slane %v1207_v14, 4  ;;  %v1868_v17 = vpop.f32.mrb[15].mxu0 }
 0x41f   :  { %v1215_v18 = vrot.slane %v1214_v15, 2  ;;  %v1247_v19 = vadd.f32 %v1246_v16, %v1207_v14 }
 0x421   :  { %v1216_v20 = vadd.f32 %v1215_v18, %v1214_v15  ;;  %v1248_v21 = vrot.slane %v1247_v19, 2 }
 0x423   :  { %v1217_v22 = vrot.slane %v1216_v20, 1  ;;  %v1249_v23 = vadd.f32 %v1248_v21, %v1247_v19 }
 0x425   :  { %v1218_v25 = vadd.f32 %v1217_v22, %v1216_v20  ;;  %v1250_v26 = vrot.slane %v1249_v23, 1 }
 0x427   :  { %v1219_v27 = vmul.f32 0.125, %v1218_v25  ;;  %v1251_v28 = vadd.f32 %v1250_v26, %v1249_v23 }
 0x429   :  { %v1220_v29 = vsub.f32 %v1204_v11, %v1219_v27  ;;  %v1252_v30 = vmul.f32 0.125, %v1251_v28 }
 0x42b   :  { %v1221_v31 = vmul.f32 %v1220_v29, %v1220_v29  ;;  %v1253_v32 = vsub.f32 %v1207_v14, %v1252_v30 }
 0x42d   :  { %v1222_v33 = vrot.slane %v1221_v31, 4  ;;  %v1254_v34 = vmul.f32 %v1253_v32, %v1253_v32 }
 0x42f   :  { %v1223_v35 = vadd.f32 %v1222_v33, %v1221_v31  ;;  %v1255_v36 = vrot.slane %v1254_v34, 4 }
 0x431   :  { %v1224_v37 = vrot.slane %v1223_v35, 2  ;;  %v1256_v38 = vadd.f32 %v1255_v36, %v1254_v34 }
 0x433   :  { %v1225_v39 = vadd.f32 %v1224_v37, %v1223_v35  ;;  %v1257_v40 = vrot.slane %v1256_v38, 2 }
 0x435   :  { %v1226_v41 = vrot.slane %v1225_v39, 1  ;;  %v1258_v42 = vadd.f32 %v1257_v40, %v1256_v38 }
 0x437   :  { %v1227_v43 = vadd.f32 %v1226_v41, %v1225_v39  ;;  %v1259_v44 = vrot.slane %v1258_v42, 1 }
 0x439   :  { %v1228_v45 = vmul.f32 0.125, %v1227_v43  ;;  %v1260_v46 = vadd.f32 %v1259_v44, %v1258_v42 }
 0x43b   :  { %v1229_v47 = vadd.f32 1e-05, %v1228_v45  ;;  %v1261_v48 = vmul.f32 0.125, %v1260_v46  ;;  %v1379_v46 = vld [vmem:[%s2606_s13] sm:$0x1] }
 0x43d   :  { %2023 = vrsqrt.f32 %v1229_v47  ;;  %v1262_v49 = vadd.f32 1e-05, %v1261_v48 }
 0x43f   :  { %2025 = vrsqrt.f32 %v1262_v49 }
 0x447   :  { %v2024_v51 = vpop.eup %2023 }
 0x448   :  { %v1231_v52 = vmul.f32 %v2024_v51, %v1211_v50 }
 0x449   :  { %v2026_v54 = vpop.eup %2025 }
 0x44a   :  { %v1236_v55 = vrot.slane %v1231_v52, %v2447_v53  ;;  %v1264_v56 = vmul.f32 %v2026_v54, %v1211_v50  ;;  %v1666_v52 = vld [vmem:[%s2607_s14] ss:$0 sm:$0xff] }
 0x44c   :  { %v1238_v58 = vmul.f32 %v1236_v55, %v1220_v29  ;;  %v1269_v59 = vrot.slane %v1264_v56, %v2447_v53 }
 0x44e   :  { %v1245_v60 = vadd.f32 %v1657_v57, %v1238_v58  ;;  %v1271_v61 = vmul.f32 %v1269_v59, %v1253_v32 }
 0x450   :  { %1556 = vst [vmem:[%s2595_s17] sm:$0xff] %v1245_v60  ;;  %v1272_v62 = vadd.f32 %v1657_v57, %v1271_v61 }
 0x452   :  { %1557 = vst [vmem:[%s2595_s17 + $0x18] sm:$0xff] %v1272_v62  ;;  %v1273_v63 = vpack.c.bf16 %v1272_v62, %v1245_v60  ;;  %v1667_v62 = vld [vmem:[%s2608_s16] ss:$0 sm:$0xff] }
 0x454   :  { %1886 = vmatmul.mubr.bf16.vlgmr.msra.gmra.mrb[12].mxu1 %v1273_v63 }
 0x527   :  { %v1372_v8 = vpop.f32.mrb[12].mxu1 }
 0x528   :  { %v1381_v9 = vrot.slane %v1372_v8, 4  ;;  %v1887_v10 = vpop.f32.mrb[13].mxu1 }
 0x529   :  { %v1375_v11 = vpop.f32.mrb[14].mxu1 }
 0x52a   :  { %v1382_v12 = vadd.f32 %v1381_v9, %v1372_v8  ;;  %v1414_v13 = vrot.slane %v1375_v11, 4  ;;  %v1888_v14 = vpop.f32.mrb[15].mxu1 }
 0x52c   :  { %v1383_v15 = vrot.slane %v1382_v12, 2  ;;  %v1415_v16 = vadd.f32 %v1414_v13, %v1375_v11 }
 0x52e   :  { %v1384_v17 = vadd.f32 %v1383_v15, %v1382_v12  ;;  %v1416_v18 = vrot.slane %v1415_v16, 2 }
 0x530   :  { %v1385_v19 = vrot.slane %v1384_v17, 1  ;;  %v1417_v20 = vadd.f32 %v1416_v18, %v1415_v16 }
 0x532   :  { %v1386_v21 = vadd.f32 %v1385_v19, %v1384_v17  ;;  %v1418_v24 = vrot.slane %v1417_v20, 1 }
 0x534   :  { %v1387_v22 = vmul.f32 0.125, %v1386_v21  ;;  %v1419_v23 = vadd.f32 %v1418_v24, %v1417_v20 }
 0x536   :  { %v1388_v25 = vsub.f32 %v1372_v8, %v1387_v22  ;;  %v1420_v26 = vmul.f32 0.125, %v1419_v23 }
 0x538   :  { %v1389_v27 = vmul.f32 %v1388_v25, %v1388_v25  ;;  %v1421_v28 = vsub.f32 %v1375_v11, %v1420_v26 }
 0x53a   :  { %v1390_v29 = vrot.slane %v1389_v27, 4  ;;  %v1422_v30 = vmul.f32 %v1421_v28, %v1421_v28 }
 0x53c   :  { %v1391_v31 = vadd.f32 %v1390_v29, %v1389_v27  ;;  %v1423_v32 = vrot.slane %v1422_v30, 4 }
 0x53e   :  { %v1392_v33 = vrot.slane %v1391_v31, 2  ;;  %v1424_v34 = vadd.f32 %v1423_v32, %v1422_v30 }
 0x540   :  { %v1393_v35 = vadd.f32 %v1392_v33, %v1391_v31  ;;  %v1425_v36 = vrot.slane %v1424_v34, 2 }
 0x542   :  { %v1394_v37 = vrot.slane %v1393_v35, 1  ;;  %v1426_v38 = vadd.f32 %v1425_v36, %v1424_v34 }
 0x544   :  { %v1395_v39 = vadd.f32 %v1394_v37, %v1393_v35  ;;  %v1427_v40 = vrot.slane %v1426_v38, 1 }
 0x546   :  { %v1396_v41 = vmul.f32 0.125, %v1395_v39  ;;  %v1428_v42 = vadd.f32 %v1427_v40, %v1426_v38 }
 0x548   :  { %v1397_v43 = vadd.f32 1e-05, %v1396_v41  ;;  %v1429_v44 = vmul.f32 0.125, %v1428_v42 }
 0x54a   :  { %2027 = vrsqrt.f32 %v1397_v43  ;;  %v1430_v45 = vadd.f32 1e-05, %v1429_v44 }
 0x54c   :  { %2029 = vrsqrt.f32 %v1430_v45 }
 0x554   :  { %v2028_v47 = vpop.eup %2027 }
 0x555   :  { %v1399_v48 = vmul.f32 %v2028_v47, %v1379_v46 }
 0x556   :  { %v2030_v49 = vpop.eup %2029 }
 0x557   :  { %v1404_v50 = vrot.slane %v1399_v48, %v2447_v53  ;;  %v1432_v51 = vmul.f32 %v2030_v49, %v1379_v46 }
 0x559   :  { %v1406_v54 = vmul.f32 %v1404_v50, %v1388_v25  ;;  %v1437_v55 = vrot.slane %v1432_v51, %v2447_v53 }
 0x55b   :  { %v1413_v56 = vadd.f32 %v1666_v52, %v1406_v54  ;;  %v1439_v57 = vmul.f32 %v1437_v55, %v1421_v28 }
 0x55d   :  { %v1440_v58 = vadd.f32 %v1666_v52, %v1439_v57  ;;  %v1441_v59 = vmax.f32 %v1413_v56, 0.0 }
 0x55f   :  { %v1442_v60 = vmax.f32 %v1440_v58, 0.0 }
 0x561   :  { %v1443_v61 = vpack.c.bf16 %v1442_v60, %v1441_v59 }
 0x563   :  { %1906 = vmatmul.mubr.bf16.vlgmr.msra.gmra.mrb[16].mxu0 %v1443_v61 }
 0x636   :  { %v1549_v63 = vpop.f32.mrb[16].mxu0 }
 0x637   :  { %v1550_v0 = vadd.f32 %v1667_v62, %v1549_v63  ;;  %v1907_v1 = vpop.f32.mrb[17].mxu0 }
 0x638   :  { %v1552_v2 = vpop.f32.mrb[18].mxu0 }
 0x639   :  { %1558 = vst [vmem:[%s2595_s17 + $0x8] sm:$0xff] %v1550_v0  ;;  %v1553_v53 = vadd.f32 %v1667_v62, %v1552_v2  ;;  %v1908_v3 = vpop.f32.mrb[19].mxu0 }
 0x63b   :  { %1559 = vst [vmem:[%s2595_s17 + $0x20] sm:$0xff] %v1553_v53 }

</bundles_post_ra>
